<compile_context>
chip_gen: v7x
topology: tpu7x:2x2x1
jax: 0.10.0
libtpu: 0.0.40
codegen_flags: <defaults>
</compile_context>

<pallas_src>
import functools

import jax
import jax.numpy as jnp
from jax import lax
from jax.experimental import pallas as pl
from jax.experimental.pallas import tpu as pltpu

_BN_EPS = 1e-5
_SIGMA_EPS = 1e-5
_LANE = 128       # vreg lane width
_SUBLANE = 8      # f32 sublane count


def _round_up(n, m):
    return ((n + m - 1) // m) * m


# ---------------------------------------------------------------------------
# Fused kernel: entire Encoder forward in a single invocation (no grid).
# refs = (x, w_stack, vec_slab, out)
#   w_stack  : [n_hidden+1, F_all, F_all]  (hidden weights + [mu|sigma] head)
#   vec_slab : [2*n_hidden+1, F_all]       (gamma_i, beta_i, ..., head bias)
# ---------------------------------------------------------------------------
def _encoder_fused_kernel(x_ref, w_ref, vec_ref, o_ref, *, n_hidden, batch, latent):
    h = x_ref[...]                                  # [B_pad, F_all] f32
    b_pad = h.shape[0]
    inv_b = jnp.float32(1.0 / batch)

    masked = b_pad != batch
    if masked:
        # Padded batch rows must be excluded from the BatchNorm statistics.
        row = lax.broadcasted_iota(jnp.int32, (b_pad, 1), 0)
        row_mask = (row < batch).astype(jnp.float32)

    for i in range(n_hidden):
        w = w_ref[i]                                # [F_all, F_all]
        g = vec_ref[2 * i:2 * i + 1, :]             # [1, F_all]
        beta = vec_ref[2 * i + 1:2 * i + 2, :]      # [1, F_all]

        # Hidden-layer Linear bias dropped: cancelled by train-mode BN.
        y = jnp.dot(h, w, preferred_element_type=jnp.float32)

        ym = y * row_mask if masked else y
        mean = jnp.sum(ym, axis=0, keepdims=True) * inv_b
        d = y - mean
        dm = d * row_mask if masked else d
        var = jnp.sum(dm * dm, axis=0, keepdims=True) * inv_b   # centered form

        scale = g * lax.rsqrt(var + _BN_EPS)        # [1, F_all] — one vreg
        shift = beta - mean * scale
        h = jnp.maximum(y * scale + shift, 0.0)     # fused BN affine + ReLU
        # Dropout(p=0.05): identity (see TODO at top of file).

    # Fused heads: one matmul producing [mu | sigma_raw | 0...] lane-dense.
    wh = w_ref[n_hidden]
    bh = vec_ref[2 * n_hidden:2 * n_hidden + 1, :]
    yh = jnp.dot(h, wh, preferred_element_type=jnp.float32) + bh

    lane = lax.broadcasted_iota(jnp.int32, (1, yh.shape[1]), 1)
    is_sigma = jnp.logical_and(lane >= latent, lane < 2 * latent)
    o_ref[...] = jnp.where(is_sigma, jnp.maximum(yh, 0.0) + _SIGMA_EPS, yh)


# ---------------------------------------------------------------------------
# Parameter construction (mimics nn.Linear default init / BN affine init)
# ---------------------------------------------------------------------------
def init_encoder_params(key, sizes):
    params = {"layers": []}
    n_hidden = len(sizes) - 2
    keys = jax.random.split(key, 2 * n_hidden + 4)
    ki = 0
    for i in range(n_hidden):
        fin, fout = sizes[i], sizes[i + 1]
        bound = 1.0 / jnp.sqrt(fin)
        w = jax.random.uniform(keys[ki], (fout, fin), jnp.float32, -bound, bound)
        b = jax.random.uniform(keys[ki + 1], (fout,), jnp.float32, -bound, bound)
        ki += 2
        params["layers"].append({
            "w_t": w.T,                              # [Fin, Fout]
            "b": b.reshape(1, fout),                 # kept for the reference only
            "gamma": jnp.ones((1, fout), jnp.float32),
            "beta": jnp.zeros((1, fout), jnp.float32),
        })
    fin, fout = sizes[-2], sizes[-1]
    bound = 1.0 / jnp.sqrt(fin)
    wmu = jax.random.uniform(keys[ki], (fout, fin), jnp.float32, -bound, bound)
    bmu = jax.random.uniform(keys[ki + 1], (fout,), jnp.float32, -bound, bound)
    ws = jax.random.uniform(keys[ki + 2], (fout, fin), jnp.float32, -bound, bound)
    bs = jax.random.uniform(keys[ki + 3], (fout,), jnp.float32, -bound, bound)
    params["mu"] = {"w_t": wmu.T, "b": bmu.reshape(1, fout)}
    params["sigma"] = {"w_t": ws.T, "b": bs.reshape(1, fout)}
    return params


def prepare_padded_params(params):
    """Pack everything into two lane-dense slabs (done ONCE, off the hot path):
       w_stack  [n_hidden+1, F_all, F_all] : hidden weights + [mu|sigma] head,
       vec_slab [2*n_hidden+1, F_all]      : gamma_i, beta_i, ..., head bias.
       Hidden-layer Linear biases are intentionally dropped (cancelled by BN)."""
    n_hidden = len(params["layers"])
    fin_last, lat = params["mu"]["w_t"].shape

    dims = [fin_last, 2 * lat]
    for lyr in params["layers"]:
        dims += list(lyr["w_t"].shape)
    f_all = _round_up(max(dims), _LANE)

    w_stack = jnp.zeros((n_hidden + 1, f_all, f_all), jnp.float32)
    vec = jnp.zeros((2 * n_hidden + 1, f_all), jnp.float32)

    for i, lyr in enumerate(params["layers"]):
        fin, fout = lyr["w_t"].shape
        w_stack = w_stack.at[i, :fin, :fout].set(lyr["w_t"])
        vec = vec.at[2 * i, :fout].set(lyr["gamma"].reshape(-1))
        vec = vec.at[2 * i + 1, :fout].set(lyr["beta"].reshape(-1))

    w_stack = w_stack.at[n_hidden, :fin_last, :lat].set(params["mu"]["w_t"])
    w_stack = w_stack.at[n_hidden, :fin_last, lat:2 * lat].set(params["sigma"]["w_t"])
    vec = vec.at[2 * n_hidden, :lat].set(params["mu"]["b"].reshape(-1))
    vec = vec.at[2 * n_hidden, lat:2 * lat].set(params["sigma"]["b"].reshape(-1))

    return {"w": w_stack, "vec": vec}


# ---------------------------------------------------------------------------
# Forward wrapper: single fused pallas_call under jit
# ---------------------------------------------------------------------------
@functools.partial(jax.jit, static_argnames=("latent",))
def encoder_forward(padded, x, latent):
    batch, fin = x.shape
    w = padded["w"]
    vec = padded["vec"]
    n_layers, f_all, _ = w.shape
    n_hidden = n_layers - 1

    b_pad = _round_up(max(batch, _SUBLANE), _SUBLANE)
    x_p = jnp.zeros((b_pad, f_all), jnp.float32).at[:batch, :fin].set(x)

    kernel = functools.partial(_encoder_fused_kernel,
                               n_hidden=n_hidden, batch=batch, latent=latent)

    out = pl.pallas_call(
        kernel,
        out_shape=jax.ShapeDtypeStruct((b_pad, f_all), jnp.float32),
        in_specs=[pl.BlockSpec(memory_space=pltpu.MemorySpace.VMEM)] * 3,
        out_specs=pl.BlockSpec(memory_space=pltpu.MemorySpace.VMEM),
    )(x_p, w, vec)

    mu = out[:batch, :latent]
    sigma = out[:batch, latent:2 * latent]
    return mu, sigma


# Pure-JAX reference (un-padded params, WITH hidden-layer bias) for checking.
def encoder_forward_ref(params, x):
    h = x
    for lyr in params["layers"]:
        y = h @ lyr["w_t"] + lyr["b"]
        mean = jnp.mean(y, axis=0, keepdims=True)
        var = jnp.mean((y - mean) ** 2, axis=0, keepdims=True)
        y = (y - mean) / jnp.sqrt(var + _BN_EPS) * lyr["gamma"] + lyr["beta"]
        h = jnp.maximum(y, 0.0)
    mu = h @ params["mu"]["w_t"] + params["mu"]["b"]
    sigma = jnp.maximum(h @ params["sigma"]["w_t"] + params["sigma"]["b"], 0.0) + _SIGMA_EPS
    return mu, sigma


if __name__ == "__main__":
    sizes = [32, 64, 48, 16]        # Encoder(sizes): two hidden layers, latent=16
    batch = 8

    key = jax.random.PRNGKey(0)
    k_param, k_x = jax.random.split(key)
    params = init_encoder_params(k_param, sizes)
    padded = prepare_padded_params(params)
    x = jax.random.normal(k_x, (batch, sizes[0]), jnp.float32)

    mu, sigma = encoder_forward(padded, x, latent=sizes[-1])
    mu, sigma = jax.block_until_ready((mu, sigma))

    mu_ref, sigma_ref = encoder_forward_ref(params, x)
    assert mu.shape == (batch, sizes[-1]) and sigma.shape == (batch, sizes[-1])
    assert jnp.allclose(mu, mu_ref, atol=1e-4, rtol=1e-4)
    assert jnp.allclose(sigma, sigma_ref, atol=1e-4, rtol=1e-4)
    assert bool(jnp.all(sigma >= _SIGMA_EPS))

    print("KERNEL_OK")
</pallas_src>

<mosaic_0001>
module attributes {stable_mosaic.version = 11 : i64} {
  func.func @_encoder_fused_kernel(%arg0: memref<8x128xf32, #tpu.memory_space<vmem>>, %arg1: memref<3x128x128xf32, #tpu.memory_space<vmem>>, %arg2: memref<5x128xf32, #tpu.memory_space<vmem>>, %arg3: memref<8x128xf32, #tpu.memory_space<vmem>>) attributes {dimension_semantics = [], scalar_prefetch = 0 : i64, scratch_operands = 0 : i64, tpu.core_type = #tpu.core_type<tc>} {
    %c0 = arith.constant 0 : index
    %c0_0 = arith.constant 0 : index
    %0 = vector.load %arg0[%c0, %c0_0] : memref<8x128xf32, #tpu.memory_space<vmem>>, vector<8x128xf32>
    %c0_1 = arith.constant 0 : index
    %c0_2 = arith.constant 0 : index
    %c0_3 = arith.constant 0 : index
    %1 = vector.load %arg1[%c0_1, %c0_2, %c0_3] : memref<3x128x128xf32, #tpu.memory_space<vmem>>, vector<1x128x128xf32>
    %2 = vector.shape_cast %1 : vector<1x128x128xf32> to vector<128x128xf32>
    %c0_4 = arith.constant 0 : index
    %c0_5 = arith.constant 0 : index
    %3 = vector.load %arg2[%c0_4, %c0_5] : memref<5x128xf32, #tpu.memory_space<vmem>>, vector<1x128xf32>
    %c1 = arith.constant 1 : index
    %c0_6 = arith.constant 0 : index
    %4 = vector.load %arg2[%c1, %c0_6] : memref<5x128xf32, #tpu.memory_space<vmem>>, vector<1x128xf32>
    %cst = arith.constant dense<0.000000e+00> : vector<8x128xf32>
    %5 = tpu.matmul %0, %2, %cst {dimension_numbers = #tpu.dot_dimension_numbers<[1], [0], [0], [1], [0, 0, 1, 1], [], []>} : vector<8x128xf32>, vector<128x128xf32>, vector<8x128xf32> -> vector<8x128xf32>
    %cst_7 = arith.constant dense<0.000000e+00> : vector<128xf32>
    %6 = vector.multi_reduction <add>, %5, %cst_7 [0] : vector<8x128xf32> to vector<128xf32>
    %7 = vector.shape_cast %6 : vector<128xf32> to vector<1x128xf32>
    %cst_8 = arith.constant 1.250000e-01 : f32
    %8 = vector.broadcast %cst_8 : f32 to vector<1x128xf32>
    %9 = arith.mulf %7, %8 : vector<1x128xf32>
    %10 = vector.broadcast %9 : vector<1x128xf32> to vector<8x128xf32>
    %11 = arith.subf %5, %10 : vector<8x128xf32>
    %12 = arith.mulf %11, %11 : vector<8x128xf32>
    %cst_9 = arith.constant dense<0.000000e+00> : vector<128xf32>
    %13 = vector.multi_reduction <add>, %12, %cst_9 [0] : vector<8x128xf32> to vector<128xf32>
    %14 = vector.shape_cast %13 : vector<128xf32> to vector<1x128xf32>
    %cst_10 = arith.constant 1.250000e-01 : f32
    %15 = vector.broadcast %cst_10 : f32 to vector<1x128xf32>
    %16 = arith.mulf %14, %15 : vector<1x128xf32>
    %cst_11 = arith.constant 9.99999974E-6 : f32
    %17 = vector.broadcast %cst_11 : f32 to vector<1x128xf32>
    %18 = arith.addf %16, %17 : vector<1x128xf32>
    %19 = math.rsqrt %18 : vector<1x128xf32>
    %20 = arith.mulf %3, %19 : vector<1x128xf32>
    %21 = arith.mulf %9, %20 : vector<1x128xf32>
    %22 = arith.subf %4, %21 : vector<1x128xf32>
    %23 = vector.broadcast %20 : vector<1x128xf32> to vector<8x128xf32>
    %24 = arith.mulf %5, %23 : vector<8x128xf32>
    %25 = vector.broadcast %22 : vector<1x128xf32> to vector<8x128xf32>
    %26 = arith.addf %24, %25 : vector<8x128xf32>
    %cst_12 = arith.constant 0.000000e+00 : f32
    %27 = vector.broadcast %cst_12 : f32 to vector<8x128xf32>
    %28 = arith.maximumf %26, %27 : vector<8x128xf32>
    %c1_13 = arith.constant 1 : index
    %c0_14 = arith.constant 0 : index
    %c0_15 = arith.constant 0 : index
    %29 = vector.load %arg1[%c1_13, %c0_14, %c0_15] : memref<3x128x128xf32, #tpu.memory_space<vmem>>, vector<1x128x128xf32>
    %30 = vector.shape_cast %29 : vector<1x128x128xf32> to vector<128x128xf32>
    %c2 = arith.constant 2 : index
    %c0_16 = arith.constant 0 : index
    %31 = vector.load %arg2[%c2, %c0_16] : memref<5x128xf32, #tpu.memory_space<vmem>>, vector<1x128xf32>
    %c3 = arith.constant 3 : index
    %c0_17 = arith.constant 0 : index
    %32 = vector.load %arg2[%c3, %c0_17] : memref<5x128xf32, #tpu.memory_space<vmem>>, vector<1x128xf32>
    %cst_18 = arith.constant dense<0.000000e+00> : vector<8x128xf32>
    %33 = tpu.matmul %28, %30, %cst_18 {dimension_numbers = #tpu.dot_dimension_numbers<[1], [0], [0], [1], [0, 0, 1, 1], [], []>} : vector<8x128xf32>, vector<128x128xf32>, vector<8x128xf32> -> vector<8x128xf32>
    %cst_19 = arith.constant dense<0.000000e+00> : vector<128xf32>
    %34 = vector.multi_reduction <add>, %33, %cst_19 [0] : vector<8x128xf32> to vector<128xf32>
    %35 = vector.shape_cast %34 : vector<128xf32> to vector<1x128xf32>
    %cst_20 = arith.constant 1.250000e-01 : f32
    %36 = vector.broadcast %cst_20 : f32 to vector<1x128xf32>
    %37 = arith.mulf %35, %36 : vector<1x128xf32>
    %38 = vector.broadcast %37 : vector<1x128xf32> to vector<8x128xf32>
    %39 = arith.subf %33, %38 : vector<8x128xf32>
    %40 = arith.mulf %39, %39 : vector<8x128xf32>
    %cst_21 = arith.constant dense<0.000000e+00> : vector<128xf32>
    %41 = vector.multi_reduction <add>, %40, %cst_21 [0] : vector<8x128xf32> to vector<128xf32>
    %42 = vector.shape_cast %41 : vector<128xf32> to vector<1x128xf32>
    %cst_22 = arith.constant 1.250000e-01 : f32
    %43 = vector.broadcast %cst_22 : f32 to vector<1x128xf32>
    %44 = arith.mulf %42, %43 : vector<1x128xf32>
    %cst_23 = arith.constant 9.99999974E-6 : f32
    %45 = vector.broadcast %cst_23 : f32 to vector<1x128xf32>
    %46 = arith.addf %44, %45 : vector<1x128xf32>
    %47 = math.rsqrt %46 : vector<1x128xf32>
    %48 = arith.mulf %31, %47 : vector<1x128xf32>
    %49 = arith.mulf %37, %48 : vector<1x128xf32>
    %50 = arith.subf %32, %49 : vector<1x128xf32>
    %51 = vector.broadcast %48 : vector<1x128xf32> to vector<8x128xf32>
    %52 = arith.mulf %33, %51 : vector<8x128xf32>
    %53 = vector.broadcast %50 : vector<1x128xf32> to vector<8x128xf32>
    %54 = arith.addf %52, %53 : vector<8x128xf32>
    %cst_24 = arith.constant 0.000000e+00 : f32
    %55 = vector.broadcast %cst_24 : f32 to vector<8x128xf32>
    %56 = arith.maximumf %54, %55 : vector<8x128xf32>
    %c2_25 = arith.constant 2 : index
    %c0_26 = arith.constant 0 : index
    %c0_27 = arith.constant 0 : index
    %57 = vector.load %arg1[%c2_25, %c0_26, %c0_27] : memref<3x128x128xf32, #tpu.memory_space<vmem>>, vector<1x128x128xf32>
    %58 = vector.shape_cast %57 : vector<1x128x128xf32> to vector<128x128xf32>
    %c4 = arith.constant 4 : index
    %c0_28 = arith.constant 0 : index
    %59 = vector.load %arg2[%c4, %c0_28] : memref<5x128xf32, #tpu.memory_space<vmem>>, vector<1x128xf32>
    %cst_29 = arith.constant dense<0.000000e+00> : vector<8x128xf32>
    %60 = tpu.matmul %56, %58, %cst_29 {dimension_numbers = #tpu.dot_dimension_numbers<[1], [0], [0], [1], [0, 0, 1, 1], [], []>} : vector<8x128xf32>, vector<128x128xf32>, vector<8x128xf32> -> vector<8x128xf32>
    %61 = vector.broadcast %59 : vector<1x128xf32> to vector<8x128xf32>
    %62 = arith.addf %60, %61 : vector<8x128xf32>
    %63 = tpu.iota {dimensions = array<i32: 1>} : vector<1x128xi32>
    %c16_i32 = arith.constant 16 : i32
    %64 = vector.broadcast %c16_i32 : i32 to vector<1x128xi32>
    %65 = arith.cmpi sge, %63, %64 : vector<1x128xi32>
    %c32_i32 = arith.constant 32 : i32
    %66 = vector.broadcast %c32_i32 : i32 to vector<1x128xi32>
    %67 = arith.cmpi slt, %63, %66 : vector<1x128xi32>
    %68 = arith.andi %65, %67 : vector<1x128xi1>
    %cst_30 = arith.constant 0.000000e+00 : f32
    %69 = vector.broadcast %cst_30 : f32 to vector<8x128xf32>
    %70 = arith.maximumf %62, %69 : vector<8x128xf32>
    %cst_31 = arith.constant 9.99999974E-6 : f32
    %71 = vector.broadcast %cst_31 : f32 to vector<8x128xf32>
    %72 = arith.addf %70, %71 : vector<8x128xf32>
    %73 = vector.shape_cast %68 : vector<1x128xi1> to vector<1x128xi1>
    %74 = vector.broadcast %73 : vector<1x128xi1> to vector<8x128xi1>
    %75 = arith.select %74, %72, %62 : vector<8x128xi1>, vector<8x128xf32>
    %c0_32 = arith.constant 0 : index
    %c0_33 = arith.constant 0 : index
    %76 = vector.load %arg3[%c0_32, %c0_33] : memref<8x128xf32, #tpu.memory_space<vmem>>, vector<8x128xf32>
    tpu.vector_store %arg3[%c0_32, %c0_33], %75 {strides = array<i32>} : memref<8x128xf32, #tpu.memory_space<vmem>>, vector<8x128xf32>,
    return
  }
}

</mosaic_0001>

<bundles_post_ra>
// kernel: encoder_forward.1
= control target key start
LH: loop header
LB: loop body
LE: loop exit
PB: predicated region body
PF: predicated region fallthrough
CT: control target
= control target key end

     0   :  { %8 = vsyncpa [#allocation3], 0  ;;  %s641_s12 = smov [#allocation2]   ;;  %s735_s0 = inlined_call_operand.vmem [shape: f32[8,128], index: 0, kind: input, shape index: {}]   ;;  %s736_s1 = inlined_call_operand.hbm [shape: f32[3,128,128], index: 1, kind: input, shape index: {}]   ;;  %s737_s2 = inlined_call_operand.vmem [shape: f32[5,128], index: 2, kind: input, shape index: {}]   ;;  %s738_s3 = inlined_call_operand.vmem [shape: f32[8,128], index: 3, kind: output, shape index: {}]  }
   0x1   :  { %s16_s13 = sshll.u32 %s641_s12, 4  ;;  %s617_s16 = scalar_lea.hbm %s736_s1, 6144  ;;  %s17_s13 = int_to_ptr.vmem [resolvable:$true] %s16_s13 }
   0x2   :  { %p618_p0 = scmp.ne.s32.totalorder %s736_s1, %s617_s16  ;;  %p621_p1 = scmp.lt.u32.totalorder %s617_s16, %s736_s1 }
   0x4   :  { %p623_p2 = pnand %p621_p1, %p618_p0 }
   0x6   :  { %626 = shalt.err (!%p623_p2)
}
   0x7   :  { %s627_s21 = scalar_lea.vmem %s17_s13, 6144  ;;  %p632_p4 = scmp.lt.s32.totalorder %s17_s13, %s17_s13 }
   0x8   :  { %p628_p3 = scmp.ne.s32.totalorder %s17_s13, %s627_s21  ;;  %p633_p5 = scmp.lt.s32.totalorder %s627_s21, %s627_s21 }
   0xa   :  { %p634_p6 = por %p633_p5, %p632_p4 }
   0xc   :  { %p635_p7 = pnand %p634_p6, %p628_p3 }
   0xe   :  { %638 = shalt.err (!%p635_p7)
}
   0xf   :  { %s642_s22 = smov 128   ;;  %s643_s23 = smov 8  }
  0x10   :  { %22 = dma.hbm_to_vmem [thread:$0]  %s736_s1, 6144, %s17_s13, [#allocation3], %s642_s22, %s642_s22, %s643_s23  }
  0x11   :  { %639 = dma.done.wait [#allocation3], 6144  }
  0x12   :  { %640 = vsyncadd [#allocation3], 4294961152  ;;  %v644_v0 = vmov 0.0|0.0   ;;  %vm645_vm0 = vmmov 0   ;;  %v646_v1 = vmov 0.0   ;;  %v29_v2 = vld [vmem:[#allocation2] sm:$0xff] }
  0x13   :  { %535 = vmatprep.subr.bf16.mxu0 %v644_v0  ;;  %462 = vmatprep.mubr.msk.f32.mxu0 %vm645_vm0, %v646_v1  ;;  %v30_v3 = vld [vmem:[#allocation2 + $0x8] sm:$0xff]  ;;  %v31_v4 = vld [vmem:[#allocation2 + $0x10] sm:$0xff]  ;;  %v32_v6 = vld [vmem:[#allocation2 + $0x18] sm:$0xff] }
  0x14   :  { %559 = vmatprep.subr.bf16.mxu1 %v644_v0  ;;  %497 = vmatprep.mubr.msk.f32.mxu1 %vm645_vm0, %v646_v1  ;;  %v536_v5 = vpack.c.bf16 %v30_v3, %v29_v2  ;;  %v539_v7 = vpack.c.bf16 %v32_v6, %v31_v4  ;;  %v33_v8 = vld [vmem:[#allocation2 + $0x20] sm:$0xff]  ;;  %v34_v9 = vld [vmem:[#allocation2 + $0x28] sm:$0xff]  ;;  %v35_v11 = vld [vmem:[#allocation2 + $0x30] sm:$0xff] }
  0x15   :  { %v542_v10 = vpack.c.bf16 %v34_v9, %v33_v8  ;;  %v36_v12 = vld [vmem:[#allocation2 + $0x38] sm:$0xff]  ;;  %v37_v14 = vld [vmem:[#allocation2 + $0x40] sm:$0xff]  ;;  %v38_v15 = vld [vmem:[#allocation2 + $0x48] sm:$0xff] }
  0x16   :  { %537 = vmatpush3.bf16.msra.mxu0 %v536_v5  ;;  %v545_v13 = vpack.c.bf16 %v36_v12, %v35_v11  ;;  %v548_v16 = vpack.c.bf16 %v38_v15, %v37_v14  ;;  %v39_v17 = vld [vmem:[#allocation2 + $0x50] sm:$0xff]  ;;  %v40_v18 = vld [vmem:[#allocation2 + $0x58] sm:$0xff]  ;;  %v41_v20 = vld [vmem:[#allocation2 + $0x60] sm:$0xff] }
  0x17   :  { %538 = vmatprep.subr.bf16.mxu0 %v644_v0  ;;  %v551_v19 = vpack.c.bf16 %v40_v18, %v39_v17  ;;  %v42_v21 = vld [vmem:[#allocation2 + $0x68] sm:$0xff]  ;;  %v43_v23 = vld [vmem:[#allocation2 + $0x70] sm:$0xff]  ;;  %v44_v24 = vld [vmem:[#allocation2 + $0x78] sm:$0xff] }
  0x18   :  { %v554_v22 = vpack.c.bf16 %v42_v21, %v41_v20  ;;  %v557_v25 = vpack.c.bf16 %v44_v24, %v43_v23  ;;  %v28_v26 = vld [vmem:[%s735_s0] sm:$0xff]  ;;  %v151_v28 = vld [vmem:[#allocation2 + $0x88] sm:$0xff]  ;;  %v152_v30 = vld [vmem:[#allocation2 + $0x90] sm:$0xff] }
  0x19   :  { %v150_v27 = vld [vmem:[#allocation2 + $0x80] sm:$0xff]  ;;  %v153_v31 = vld [vmem:[#allocation2 + $0x98] sm:$0xff]  ;;  %v155_v34 = vld [vmem:[#allocation2 + $0xa8] sm:$0xff] }
  0x1a   :  { %540 = vmatpush3.bf16.msra.mxu0 %v539_v7  ;;  %v560_v29 = vpack.c.bf16 %v151_v28, %v150_v27  ;;  %v563_v32 = vpack.c.bf16 %v153_v31, %v152_v30  ;;  %v154_v33 = vld [vmem:[#allocation2 + $0xa0] sm:$0xff]  ;;  %v156_v36 = vld [vmem:[#allocation2 + $0xb0] sm:$0xff]  ;;  %v157_v37 = vld [vmem:[#allocation2 + $0xb8] sm:$0xff]  ;;  %v138_v7 = vlaneseq }
  0x1b   :  { %541 = vmatprep.subr.bf16.mxu0 %v644_v0  ;;  %v566_v35 = vpack.c.bf16 %v155_v34, %v154_v33  ;;  %v569_v38 = vpack.c.bf16 %v157_v37, %v156_v36  ;;  %v158_v39 = vld [vmem:[#allocation2 + $0xc0] sm:$0xff]  ;;  %v159_v40 = vld [vmem:[#allocation2 + $0xc8] sm:$0xff]  ;;  %v160_v42 = vld [vmem:[#allocation2 + $0xd0] sm:$0xff] }
  0x1c   :  { %561 = vmatpush3.bf16.msra.mxu1 %v560_v29  ;;  %v572_v41 = vpack.c.bf16 %v159_v40, %v158_v39  ;;  %v161_v43 = vld [vmem:[#allocation2 + $0xd8] sm:$0xff]  ;;  %v162_v45 = vld [vmem:[#allocation2 + $0xe0] sm:$0xff]  ;;  %v163_v46 = vld [vmem:[#allocation2 + $0xe8] sm:$0xff]  ;;  %v139_v8 = vshrl.u32 %v138_v7, 7 }
  0x1d   :  { %562 = vmatprep.subr.bf16.mxu1 %v644_v0  ;;  %v575_v44 = vpack.c.bf16 %v161_v43, %v160_v42  ;;  %v578_v47 = vpack.c.bf16 %v163_v46, %v162_v45  ;;  %v164_v48 = vld [vmem:[#allocation2 + $0xf0] sm:$0xff]  ;;  %v165_v49 = vld [vmem:[#allocation2 + $0xf8] sm:$0xff]  ;;  %v45_v9 = vld [vmem:[%s737_s2] sm:$0x1] }
  0x1e   :  { %543 = vmatpush3.bf16.msra.mxu0 %v542_v10  ;;  %v581_v50 = vpack.c.bf16 %v165_v49, %v164_v48  ;;  %v706_v10 = vsub.s32 0, %v139_v8  ;;  %v271_v21 = vld [vmem:[#allocation2 + $0x100] sm:$0xff]  ;;  %v273_v24 = vld [vmem:[#allocation2 + $0x110] sm:$0xff]  ;;  %v276_v28 = vld [vmem:[#allocation2 + $0x128] sm:$0xff] }
  0x1f   :  { %544 = vmatprep.subr.bf16.mxu0 %v644_v0  ;;  %v275_v27 = vld [vmem:[#allocation2 + $0x120] sm:$0xff]  ;;  %v277_v30 = vld [vmem:[#allocation2 + $0x130] sm:$0xff]  ;;  %v278_v31 = vld [vmem:[#allocation2 + $0x138] sm:$0xff] }
  0x20   :  { %564 = vmatpush3.bf16.msra.mxu1 %v563_v32  ;;  %v590_v29 = vpack.c.bf16 %v276_v28, %v275_v27  ;;  %v593_v32 = vpack.c.bf16 %v278_v31, %v277_v30  ;;  %v279_v33 = vld [vmem:[#allocation2 + $0x140] sm:$0xff]  ;;  %v280_v34 = vld [vmem:[#allocation2 + $0x148] sm:$0xff]  ;;  %v281_v36 = vld [vmem:[#allocation2 + $0x150] sm:$0xff] }
  0x21   :  { %565 = vmatprep.subr.bf16.mxu1 %v644_v0  ;;  %v282_v37 = vld [vmem:[#allocation2 + $0x158] sm:$0xff]  ;;  %v283_v39 = vld [vmem:[#allocation2 + $0x160] sm:$0xff]  ;;  %v284_v40 = vld [vmem:[#allocation2 + $0x168] sm:$0xff] }
  0x22   :  { %546 = vmatpush3.bf16.msra.mxu0 %v545_v13  ;;  %v46_v13 = vld [vmem:[%s737_s2 + $0x1] sm:$0x1]  ;;  %v285_v42 = vld [vmem:[#allocation2 + $0x170] sm:$0xff]  ;;  %v286_v43 = vld [vmem:[#allocation2 + $0x178] sm:$0xff] }
  0x23   :  { %547 = vmatprep.subr.bf16.mxu0 %v644_v0 }
  0x24   :  { %567 = vmatpush3.bf16.msra.mxu1 %v566_v35  ;;  %v596_v35 = vpack.c.bf16 %v280_v34, %v279_v33 }
  0x25   :  { %568 = vmatprep.subr.bf16.mxu1 %v644_v0 }
  0x26   :  { %549 = vmatpush3.bf16.msra.mxu0 %v548_v16 }
  0x27   :  { %550 = vmatprep.subr.bf16.mxu0 %v644_v0 }
  0x28   :  { %570 = vmatpush3.bf16.msra.mxu1 %v569_v38  ;;  %v599_v38 = vpack.c.bf16 %v282_v37, %v281_v36 }
  0x29   :  { %571 = vmatprep.subr.bf16.mxu1 %v644_v0 }
  0x2a   :  { %552 = vmatpush3.bf16.msra.mxu0 %v551_v19 }
  0x2b   :  { %553 = vmatprep.subr.bf16.mxu0 %v644_v0 }
  0x2c   :  { %573 = vmatpush3.bf16.msra.mxu1 %v572_v41  ;;  %v602_v41 = vpack.c.bf16 %v284_v40, %v283_v39 }
  0x2d   :  { %574 = vmatprep.subr.bf16.mxu1 %v644_v0 }
  0x2e   :  { %555 = vmatpush3.bf16.msra.mxu0 %v554_v22  ;;  %v272_v22 = vld [vmem:[#allocation2 + $0x108] sm:$0xff] }
  0x2f   :  { %556 = vmatprep.subr.bf16.mxu0 %v644_v0  ;;  %v584_v23 = vpack.c.bf16 %v272_v22, %v271_v21 }
  0x30   :  { %576 = vmatpush3.bf16.msra.mxu1 %v575_v44  ;;  %v605_v44 = vpack.c.bf16 %v286_v43, %v285_v42 }
  0x31   :  { %577 = vmatprep.subr.bf16.mxu1 %v644_v0 }
  0x32   :  { %558 = vmatpush3.bf16.msra.mxu0 %v557_v25  ;;  %v274_v25 = vld [vmem:[#allocation2 + $0x118] sm:$0xff] }
  0x33   :  { %583 = vmatprep.subr.bf16.mxu0 %v644_v0 }
  0x34   :  { %579 = vmatpush3.bf16.msra.mxu1 %v578_v47 }
  0x35   :  { %463 = vmatmul.mubr.f32.vlgmr.msra.gmra.mrb[0].mxu0 %v28_v26  ;;  %580 = vmatprep.subr.bf16.mxu1 %v644_v0  ;;  %v587_v26 = vpack.c.bf16 %v274_v25, %v273_v24 }
  0x36   :  { %532 = vmatprep.mubr.msk.f32.mxu0 %vm645_vm0, %v646_v1  ;;  %585 = vmatpush3.bf16.msra.mxu0 %v584_v23 }
  0x37   :  { %586 = vmatprep.subr.bf16.mxu0 %v644_v0 }
  0x38   :  { %582 = vmatpush3.bf16.msra.mxu1 %v581_v50 }
  0x3a   :  { %588 = vmatpush3.bf16.msra.mxu0 %v587_v26 }
  0x3b   :  { %589 = vmatprep.subr.bf16.mxu0 %v644_v0 }
  0x3e   :  { %591 = vmatpush3.bf16.msra.mxu0 %v590_v29 }
  0x3f   :  { %592 = vmatprep.subr.bf16.mxu0 %v644_v0 }
  0x42   :  { %594 = vmatpush3.bf16.msra.mxu0 %v593_v32 }
  0x43   :  { %595 = vmatprep.subr.bf16.mxu0 %v644_v0 }
  0x46   :  { %597 = vmatpush3.bf16.msra.mxu0 %v596_v35 }
  0x47   :  { %598 = vmatprep.subr.bf16.mxu0 %v644_v0 }
  0x4a   :  { %600 = vmatpush3.bf16.msra.mxu0 %v599_v38 }
  0x4b   :  { %601 = vmatprep.subr.bf16.mxu0 %v644_v0 }
  0x4e   :  { %603 = vmatpush3.bf16.msra.mxu0 %v602_v41 }
  0x4f   :  { %604 = vmatprep.subr.bf16.mxu0 %v644_v0 }
  0x52   :  { %606 = vmatpush3.bf16.msra.mxu0 %v605_v44 }
 0x108   :  { %v113_v51 = vpop.f32.mrb[0].mxu0 }
 0x109   :  { %v117_v52 = vrot.slane %v113_v51, 4  ;;  %v464_v53 = vpop.f32.mrb[1].mxu0 }
 0x10b   :  { %v118_v54 = vadd.f32 %v117_v52, %v113_v51 }
 0x10d   :  { %v119_v55 = vrot.slane %v118_v54, 2 }
 0x10f   :  { %v120_v56 = vadd.f32 %v119_v55, %v118_v54 }
 0x111   :  { %v121_v57 = vrot.slane %v120_v56, 1 }
 0x113   :  { %v122_v58 = vadd.f32 %v121_v57, %v120_v56 }
 0x115   :  { %v123_v59 = vmul.f32 0.125, %v122_v58 }
 0x117   :  { %v124_v60 = vsub.f32 %v113_v51, %v123_v59 }
 0x119   :  { %v125_v61 = vmul.f32 %v124_v60, %v124_v60 }
 0x11b   :  { %v126_v62 = vrot.slane %v125_v61, 4 }
 0x11d   :  { %v127_v63 = vadd.f32 %v126_v62, %v125_v61 }
 0x11f   :  { %v128_v1 = vrot.slane %v127_v63, 2 }
 0x121   :  { %v129_v2 = vadd.f32 %v128_v1, %v127_v63  ;;  %v166_v63 = vld [vmem:[%s737_s2 + $0x2] sm:$0x1] }
 0x123   :  { %v130_v3 = vrot.slane %v129_v2, 1 }
 0x125   :  { %v131_v4 = vadd.f32 %v130_v3, %v129_v2  ;;  %v167_v3 = vld [vmem:[%s737_s2 + $0x3] sm:$0x1] }
 0x127   :  { %v132_v5 = vmul.f32 0.125, %v131_v4 }
 0x129   :  { %v133_v6 = vadd.f32 1e-05, %v132_v5 }
 0x12b   :  { %613 = vrsqrt.f32 %v133_v6 }
 0x135   :  { %v614_v11 = vpop.eup %613 }
 0x136   :  { %v135_v12 = vmul.f32 %v614_v11, %v45_v9 }
 0x138   :  { %v136_v14 = vmul.f32 %v135_v12, %v123_v59  ;;  %v141_v15 = vrot.slane %v135_v12, %v706_v10 }
 0x13a   :  { %v137_v16 = vsub.f32 %v46_v13, %v136_v14  ;;  %v142_v17 = vmul.f32 %v141_v15, %v113_v51  ;;  %v363_v13 = vand.u32 127, %v138_v7  ;;  %v378_v14 = vld [vmem:[%s737_s2 + $0x4] ss:$0 sm:$0xff] }
 0x13c   :  { %v146_v18 = vrot.slane %v137_v16, %v706_v10  ;;  %vm364_vm1 = vcmp.ge.s32.totalorder %v363_v13, 16  ;;  %vm365_vm2 = vcmp.lt.s32.totalorder %v363_v13, 32 }
 0x13d   :  { %vm366_vm3 = vmand %vm364_vm1, %vm365_vm2 }
 0x13e   :  { %v147_v19 = vadd.f32 %v146_v18, %v142_v17 }
 0x140   :  { %v148_v20 = vmax.f32 %v147_v19, 0.0 }
 0x142   :  { %498 = vmatmul.mubr.f32.vlgmr.msra.gmra.mrb[0].mxu1 %v148_v20 }
 0x215   :  { %v234_v45 = vpop.f32.mrb[0].mxu1 }
 0x216   :  { %v238_v46 = vrot.slane %v234_v45, 4  ;;  %v499_v47 = vpop.f32.mrb[1].mxu1 }
 0x218   :  { %v239_v48 = vadd.f32 %v238_v46, %v234_v45 }
 0x21a   :  { %v240_v49 = vrot.slane %v239_v48, 2 }
 0x21c   :  { %v241_v50 = vadd.f32 %v240_v49, %v239_v48 }
 0x21e   :  { %v242_v51 = vrot.slane %v241_v50, 1 }
 0x220   :  { %v243_v52 = vadd.f32 %v242_v51, %v241_v50 }
 0x222   :  { %v244_v53 = vmul.f32 0.125, %v243_v52 }
 0x224   :  { %v245_v54 = vsub.f32 %v234_v45, %v244_v53 }
 0x226   :  { %v246_v55 = vmul.f32 %v245_v54, %v245_v54 }
 0x228   :  { %v247_v56 = vrot.slane %v246_v55, 4 }
 0x22a   :  { %v248_v57 = vadd.f32 %v247_v56, %v246_v55 }
 0x22c   :  { %v249_v58 = vrot.slane %v248_v57, 2 }
 0x22e   :  { %v250_v59 = vadd.f32 %v249_v58, %v248_v57 }
 0x230   :  { %v251_v0 = vrot.slane %v250_v59, 1 }
 0x232   :  { %v252_v60 = vadd.f32 %v251_v0, %v250_v59 }
 0x234   :  { %v253_v61 = vmul.f32 0.125, %v252_v60 }
 0x236   :  { %v254_v62 = vadd.f32 1e-05, %v253_v61 }
 0x238   :  { %615 = vrsqrt.f32 %v254_v62 }
 0x242   :  { %v616_v1 = vpop.eup %615 }
 0x243   :  { %v256_v2 = vmul.f32 %v616_v1, %v166_v63 }
 0x245   :  { %v257_v4 = vmul.f32 %v256_v2, %v244_v53  ;;  %v262_v5 = vrot.slane %v256_v2, %v706_v10 }
 0x247   :  { %v258_v6 = vsub.f32 %v167_v3, %v257_v4  ;;  %v263_v8 = vmul.f32 %v262_v5, %v234_v45 }
 0x249   :  { %v267_v9 = vrot.slane %v258_v6, %v706_v10 }
 0x24b   :  { %v268_v11 = vadd.f32 %v267_v9, %v263_v8 }
 0x24d   :  { %v269_v12 = vmax.f32 %v268_v11, 0.0 }
 0x24f   :  { %533 = vmatmul.mubr.f32.vlgmr.msra.gmra.mrb[2].mxu0 %v269_v12 }
 0x322   :  { %v358_v15 = vpop.f32.mrb[2].mxu0 }
 0x323   :  { %v359_v16 = vadd.f32 %v378_v14, %v358_v15  ;;  %v534_v17 = vpop.f32.mrb[3].mxu0 }
 0x325   :  { %v367_v18 = vmax.f32 %v359_v16, 0.0 }
 0x327   :  { %v368_v19 = vadd.f32 1e-05, %v367_v18 }
 0x329   :  { %v371_v20 = vsel %vm366_vm3, %v368_v19, %v359_v16 }
 0x32a   :  { %372 = vst [vmem:[%s738_s3] sm:$0xff] %v371_v20 }
 0x32b   :  { %377 = vsyncpa [#allocation3], 1 }

</bundles_post_ra>
